<compile_context>
chip_gen: v7x
topology: tpu7x:2x2x1
jax: 0.10.0
libtpu: 0.0.40
codegen_flags: <defaults>
</compile_context>

<pallas_src>
import jax
import jax.numpy as jnp
from jax.experimental import pallas as pl
from jax.experimental.pallas import tpu as pltpu

EPS = 1e-5


# ----------------------------- wrapper-side weight preprocessing ------------

def _conv3x3_row_tap_matrices(w_hwio, W):
    """Fold the 3 W-taps (and W zero-padding) of a 3x3 conv into a
    block-Toeplitz matrix per H-tap.

    w_hwio: (3, 3, Ci, Co).  Returns B of shape (3, W*Ci, W*Co) with
      B[dy, w_in*Ci + ci, w_out*Co + co] = w[dy, w_in - w_out + 1, ci, co]
    (zero when the dx index is out of range, which implements padding=1 in W).
    """
    KH, KW, Ci, Co = w_hwio.shape
    # shift[dx, u, w] = 1  iff  u == w + dx - 1
    shift = jnp.stack([jnp.eye(W, k=1 - dx, dtype=w_hwio.dtype) for dx in range(KW)])
    b = jnp.einsum('xuw,yxio->yuiwo', shift, w_hwio)        # (KH, W, Ci, W, Co)
    return b.reshape(KH, W * Ci, W * Co)


def _channel_avg_matrix(W, C, count):
    """(W*C, W*C) matrix A with A[i, j] = [chan(i) == chan(j)] / count.
    rowvec @ A  ==  per-channel mean of rowvec, broadcast back to every column
    of that channel — one tiny MXU op instead of lane<->sublane reshuffles."""
    return jnp.tile(jnp.eye(C, dtype=jnp.float32), (W, W)) / float(count)


# ----------------------------- kernel ----------------------------------------

def _batchnorm_cols(acc, amat, gamma, beta):
    """Training-mode BatchNorm on an (M, W*C) activation, single-pass stats.
    amat: (W*C, W*C) channel-average matrix (includes the 1/(N*H*W) factor).
    gamma/beta: (1, W*C), pre-tiled to the column layout."""
    s = jnp.sum(acc, axis=0, keepdims=True)                 # (1, W*C)
    q = jnp.sum(acc * acc, axis=0, keepdims=True)           # (1, W*C)
    mean = jnp.dot(s, amat, preferred_element_type=jnp.float32)
    ex2 = jnp.dot(q, amat, preferred_element_type=jnp.float32)
    var = ex2 - mean * mean                                 # biased batch variance
    scale = gamma * jax.lax.rsqrt(var + EPS)
    return (acc - mean) * scale + beta


def basic_block_kernel(x_ref, b1_ref, b2_ref, a1_ref, a2_ref,
                       g1_ref, be1_ref, g2_ref, be2_ref,
                       out_ref, xpad1_ref, xpad2_ref):
    # x_ref    : (N, H, W*Cin)        input, (w, c) flattened into lanes
    # b*_ref   : (3, W*Ci, W*Co)      block-Toeplitz conv weights (per H-tap)
    # a*_ref   : (W*C, W*C)           channel-averaging matrices for BN stats
    # g*/be*   : (1, W*C)             BN gamma/beta tiled to column layout
    # out_ref  : (N*H, W*Cout)
    # xpad*_ref: (N, H+2, W*C)        VMEM scratch, H halo only (border rows)
    N, H, WCin = x_ref.shape
    WCmid = xpad2_ref.shape[2]
    M = N * H

    xv = x_ref[...]                                         # single read of x

    # ---- conv1: 3 row-tap matmuls, K = W*Cin; W taps + W padding live in b1 ----
    zrow1 = jnp.zeros((N, 1, WCin), jnp.float32)
    xpad1_ref[:, 0:1, :] = zrow1                            # zero border rows only
    xpad1_ref[:, H + 1:H + 2, :] = zrow1
    xpad1_ref[:, 1:H + 1, :] = xv                           # interior written once

    acc1 = jnp.dot(xpad1_ref[:, 0:H, :].reshape(M, WCin), b1_ref[0],
                   preferred_element_type=jnp.float32)
    for dy in range(1, 3):
        acc1 = acc1 + jnp.dot(xpad1_ref[:, dy:dy + H, :].reshape(M, WCin),
                              b1_ref[dy], preferred_element_type=jnp.float32)

    # ---- bn1 (batch stats) + relu ----
    y1 = jnp.maximum(
        _batchnorm_cols(acc1, a1_ref[...], g1_ref[...], be1_ref[...]), 0.0)

    # ---- conv2 ----
    zrow2 = jnp.zeros((N, 1, WCmid), jnp.float32)
    xpad2_ref[:, 0:1, :] = zrow2
    xpad2_ref[:, H + 1:H + 2, :] = zrow2
    xpad2_ref[:, 1:H + 1, :] = y1.reshape(N, H, WCmid)

    acc2 = jnp.dot(xpad2_ref[:, 0:H, :].reshape(M, WCmid), b2_ref[0],
                   preferred_element_type=jnp.float32)
    for dy in range(1, 3):
        acc2 = acc2 + jnp.dot(xpad2_ref[:, dy:dy + H, :].reshape(M, WCmid),
                              b2_ref[dy], preferred_element_type=jnp.float32)

    # ---- bn2 + residual add + relu (downsample=None -> same column layout) ----
    y2 = _batchnorm_cols(acc2, a2_ref[...], g2_ref[...], be2_ref[...])
    out_ref[...] = jnp.maximum(y2 + xv.reshape(M, WCin), 0.0)


# ----------------------------- wrapper ----------------------------------------

def basic_block(x_nchw, w1, g1, b1, w2, g2, b2):
    """BasicBlock forward. x_nchw: (N, Cin, H, W). stride=1, downsample=None."""
    x = jnp.transpose(x_nchw, (0, 2, 3, 1)).astype(jnp.float32)   # NHWC
    N, H, W, Cin = x.shape
    Cmid, Cout = w1.shape[-1], w2.shape[-1]
    assert Cin == Cout, "downsample=None requires inplanes == planes"

    # One-time (per-weight) preprocessing; in a real model this is done at load.
    B1 = _conv3x3_row_tap_matrices(w1.astype(jnp.float32), W)   # (3, W*Cin,  W*Cmid)
    B2 = _conv3x3_row_tap_matrices(w2.astype(jnp.float32), W)   # (3, W*Cmid, W*Cout)
    A1 = _channel_avg_matrix(W, Cmid, N * H * W)                # (W*Cmid, W*Cmid)
    A2 = _channel_avg_matrix(W, Cout, N * H * W)                # (W*Cout, W*Cout)
    g1c = jnp.tile(g1.astype(jnp.float32), W).reshape(1, W * Cmid)
    b1c = jnp.tile(b1.astype(jnp.float32), W).reshape(1, W * Cmid)
    g2c = jnp.tile(g2.astype(jnp.float32), W).reshape(1, W * Cout)
    b2c = jnp.tile(b2.astype(jnp.float32), W).reshape(1, W * Cout)

    x2d = x.reshape(N, H, W * Cin)          # lane-dense layout: last axis = W*Cin

    vmem = pl.BlockSpec(memory_space=pltpu.MemorySpace.VMEM)
    out = pl.pallas_call(
        basic_block_kernel,
        out_shape=jax.ShapeDtypeStruct((N * H, W * Cout), jnp.float32),
        in_specs=[vmem] * 9,
        out_specs=vmem,
        scratch_shapes=[pltpu.VMEM((N, H + 2, W * Cin), jnp.float32),
                        pltpu.VMEM((N, H + 2, W * Cmid), jnp.float32)],
        compiler_params=pltpu.CompilerParams(vmem_limit_bytes=32 * 1024 * 1024),
    )(x2d, B1, B2, A1, A2, g1c, b1c, g2c, b2c)

    out = out.reshape(N, H, W, Cout)
    return jnp.transpose(out, (0, 3, 1, 2))   # back to NCHW


# ----------------------------- pure-JAX reference ------------------------------

def ref_forward(x_nhwc, w1, g1, b1, w2, g2, b2):
    dn = jax.lax.conv_dimension_numbers(x_nhwc.shape, w1.shape,
                                        ('NHWC', 'HWIO', 'NHWC'))
    o = jax.lax.conv_general_dilated(x_nhwc, w1, (1, 1), ((1, 1), (1, 1)),
                                     dimension_numbers=dn)
    m = o.mean(axis=(0, 1, 2))
    v = ((o - m) ** 2).mean(axis=(0, 1, 2))
    o = (o - m) / jnp.sqrt(v + EPS) * g1 + b1
    o = jnp.maximum(o, 0.0)
    o2 = jax.lax.conv_general_dilated(o, w2, (1, 1), ((1, 1), (1, 1)),
                                      dimension_numbers=dn)
    m2 = o2.mean(axis=(0, 1, 2))
    v2 = ((o2 - m2) ** 2).mean(axis=(0, 1, 2))
    o2 = (o2 - m2) / jnp.sqrt(v2 + EPS) * g2 + b2
    return jnp.maximum(o2 + x_nhwc, 0.0)


if __name__ == "__main__":
    # BasicBlock(inplanes=4, planes=4, cfg=8, stride=1, downsample=None)
    N, Cin, H, W = 2, 4, 16, 16
    Cfg, Cout = 8, 4

    key = jax.random.PRNGKey(0)
    k1, k2, k3, k4, k5, k6, k7 = jax.random.split(key, 7)
    x = jax.random.normal(k1, (N, Cin, H, W), jnp.float32)
    w1 = 0.1 * jax.random.normal(k2, (3, 3, Cin, Cfg), jnp.float32)   # HWIO
    w2 = 0.1 * jax.random.normal(k3, (3, 3, Cfg, Cout), jnp.float32)  # HWIO
    g1 = 1.0 + 0.1 * jax.random.normal(k4, (Cfg,), jnp.float32)
    b1 = 0.1 * jax.random.normal(k5, (Cfg,), jnp.float32)
    g2 = 1.0 + 0.1 * jax.random.normal(k6, (Cout,), jnp.float32)
    b2 = 0.1 * jax.random.normal(k7, (Cout,), jnp.float32)

    out = basic_block(x, w1, g1, b1, w2, g2, b2)
    jax.block_until_ready(out)

    ref = ref_forward(jnp.transpose(x, (0, 2, 3, 1)), w1, g1, b1, w2, g2, b2)
    ref = jnp.transpose(ref, (0, 3, 1, 2))
    assert out.shape == (N, Cout, H, W)
    assert jnp.allclose(out, ref, atol=1e-4, rtol=1e-4), \
        f"max abs err = {jnp.max(jnp.abs(out - ref))}"
    print("KERNEL_OK")
</pallas_src>

<mosaic_0001>
module attributes {stable_mosaic.version = 11 : i64} {
  func.func @basic_block_kernel(%arg0: memref<2x16x64xf32, #tpu.memory_space<vmem>>, %arg1: memref<3x64x128xf32, #tpu.memory_space<vmem>>, %arg2: memref<3x128x64xf32, #tpu.memory_space<vmem>>, %arg3: memref<128x128xf32, #tpu.memory_space<vmem>>, %arg4: memref<64x64xf32, #tpu.memory_space<vmem>>, %arg5: memref<1x128xf32, #tpu.memory_space<vmem>>, %arg6: memref<1x128xf32, #tpu.memory_space<vmem>>, %arg7: memref<1x64xf32, #tpu.memory_space<vmem>>, %arg8: memref<1x64xf32, #tpu.memory_space<vmem>>, %arg9: memref<32x64xf32, #tpu.memory_space<vmem>>, %arg10: memref<2x18x64xf32, #tpu.memory_space<vmem>>, %arg11: memref<2x18x128xf32, #tpu.memory_space<vmem>>) attributes {dimension_semantics = [], scalar_prefetch = 0 : i64, scratch_operands = 2 : i64, tpu.core_type = #tpu.core_type<tc>} {
    %c0 = arith.constant 0 : index
    %c0_0 = arith.constant 0 : index
    %c0_1 = arith.constant 0 : index
    %0 = vector.load %arg0[%c0, %c0_0, %c0_1] : memref<2x16x64xf32, #tpu.memory_space<vmem>>, vector<2x16x64xf32>
    %cst = arith.constant 0.000000e+00 : f32
    %1 = vector.broadcast %cst : f32 to vector<2x1x64xf32>
    %c0_2 = arith.constant 0 : index
    %c0_3 = arith.constant 0 : index
    %c0_4 = arith.constant 0 : index
    %2 = vector.load %arg10[%c0_2, %c0_3, %c0_4] : memref<2x18x64xf32, #tpu.memory_space<vmem>>, vector<2x1x64xf32>
    tpu.vector_store %arg10[%c0_2, %c0_3, %c0_4], %1 {strides = array<i32>} : memref<2x18x64xf32, #tpu.memory_space<vmem>>, vector<2x1x64xf32>,
    %c0_5 = arith.constant 0 : index
    %c17 = arith.constant 17 : index
    %c0_6 = arith.constant 0 : index
    %3 = vector.load %arg10[%c0_5, %c17, %c0_6] : memref<2x18x64xf32, #tpu.memory_space<vmem>>, vector<2x1x64xf32>
    tpu.vector_store %arg10[%c0_5, %c17, %c0_6], %1 {strides = array<i32>} : memref<2x18x64xf32, #tpu.memory_space<vmem>>, vector<2x1x64xf32>,
    %c0_7 = arith.constant 0 : index
    %c1 = arith.constant 1 : index
    %c0_8 = arith.constant 0 : index
    %4 = vector.load %arg10[%c0_7, %c1, %c0_8] : memref<2x18x64xf32, #tpu.memory_space<vmem>>, vector<2x16x64xf32>
    tpu.vector_store %arg10[%c0_7, %c1, %c0_8], %0 {strides = array<i32>} : memref<2x18x64xf32, #tpu.memory_space<vmem>>, vector<2x16x64xf32>,
    %c0_9 = arith.constant 0 : index
    %c0_10 = arith.constant 0 : index
    %c0_11 = arith.constant 0 : index
    %5 = vector.load %arg10[%c0_9, %c0_10, %c0_11] : memref<2x18x64xf32, #tpu.memory_space<vmem>>, vector<2x16x64xf32>
    %6 = vector.shape_cast %5 : vector<2x16x64xf32> to vector<32x64xf32>
    %c0_12 = arith.constant 0 : index
    %c0_13 = arith.constant 0 : index
    %c0_14 = arith.constant 0 : index
    %7 = vector.load %arg1[%c0_12, %c0_13, %c0_14] : memref<3x64x128xf32, #tpu.memory_space<vmem>>, vector<1x64x128xf32>
    %8 = vector.shape_cast %7 : vector<1x64x128xf32> to vector<64x128xf32>
    %cst_15 = arith.constant dense<0.000000e+00> : vector<32x128xf32>
    %9 = tpu.matmul %6, %8, %cst_15 {dimension_numbers = #tpu.dot_dimension_numbers<[1], [0], [0], [1], [0, 0, 1, 1], [], []>} : vector<32x64xf32>, vector<64x128xf32>, vector<32x128xf32> -> vector<32x128xf32>
    %c0_16 = arith.constant 0 : index
    %c1_17 = arith.constant 1 : index
    %c0_18 = arith.constant 0 : index
    %10 = vector.load %arg10[%c0_16, %c1_17, %c0_18] : memref<2x18x64xf32, #tpu.memory_space<vmem>>, vector<2x16x64xf32>
    %11 = vector.shape_cast %10 : vector<2x16x64xf32> to vector<32x64xf32>
    %c1_19 = arith.constant 1 : index
    %c0_20 = arith.constant 0 : index
    %c0_21 = arith.constant 0 : index
    %12 = vector.load %arg1[%c1_19, %c0_20, %c0_21] : memref<3x64x128xf32, #tpu.memory_space<vmem>>, vector<1x64x128xf32>
    %13 = vector.shape_cast %12 : vector<1x64x128xf32> to vector<64x128xf32>
    %cst_22 = arith.constant dense<0.000000e+00> : vector<32x128xf32>
    %14 = tpu.matmul %11, %13, %cst_22 {dimension_numbers = #tpu.dot_dimension_numbers<[1], [0], [0], [1], [0, 0, 1, 1], [], []>} : vector<32x64xf32>, vector<64x128xf32>, vector<32x128xf32> -> vector<32x128xf32>
    %15 = arith.addf %9, %14 : vector<32x128xf32>
    %c0_23 = arith.constant 0 : index
    %c2 = arith.constant 2 : index
    %c0_24 = arith.constant 0 : index
    %16 = vector.load %arg10[%c0_23, %c2, %c0_24] : memref<2x18x64xf32, #tpu.memory_space<vmem>>, vector<2x16x64xf32>
    %17 = vector.shape_cast %16 : vector<2x16x64xf32> to vector<32x64xf32>
    %c2_25 = arith.constant 2 : index
    %c0_26 = arith.constant 0 : index
    %c0_27 = arith.constant 0 : index
    %18 = vector.load %arg1[%c2_25, %c0_26, %c0_27] : memref<3x64x128xf32, #tpu.memory_space<vmem>>, vector<1x64x128xf32>
    %19 = vector.shape_cast %18 : vector<1x64x128xf32> to vector<64x128xf32>
    %cst_28 = arith.constant dense<0.000000e+00> : vector<32x128xf32>
    %20 = tpu.matmul %17, %19, %cst_28 {dimension_numbers = #tpu.dot_dimension_numbers<[1], [0], [0], [1], [0, 0, 1, 1], [], []>} : vector<32x64xf32>, vector<64x128xf32>, vector<32x128xf32> -> vector<32x128xf32>
    %21 = arith.addf %15, %20 : vector<32x128xf32>
    %c0_29 = arith.constant 0 : index
    %c0_30 = arith.constant 0 : index
    %22 = vector.load %arg3[%c0_29, %c0_30] : memref<128x128xf32, #tpu.memory_space<vmem>>, vector<128x128xf32>
    %c0_31 = arith.constant 0 : index
    %c0_32 = arith.constant 0 : index
    %23 = vector.load %arg5[%c0_31, %c0_32] : memref<1x128xf32, #tpu.memory_space<vmem>>, vector<1x128xf32>
    %c0_33 = arith.constant 0 : index
    %c0_34 = arith.constant 0 : index
    %24 = vector.load %arg6[%c0_33, %c0_34] : memref<1x128xf32, #tpu.memory_space<vmem>>, vector<1x128xf32>
    %cst_35 = arith.constant dense<0.000000e+00> : vector<128xf32>
    %25 = vector.multi_reduction <add>, %21, %cst_35 [0] : vector<32x128xf32> to vector<128xf32>
    %26 = vector.shape_cast %25 : vector<128xf32> to vector<1x128xf32>
    %27 = arith.mulf %21, %21 : vector<32x128xf32>
    %cst_36 = arith.constant dense<0.000000e+00> : vector<128xf32>
    %28 = vector.multi_reduction <add>, %27, %cst_36 [0] : vector<32x128xf32> to vector<128xf32>
    %29 = vector.shape_cast %28 : vector<128xf32> to vector<1x128xf32>
    %cst_37 = arith.constant dense<0.000000e+00> : vector<1x128xf32>
    %30 = tpu.matmul %26, %22, %cst_37 {dimension_numbers = #tpu.dot_dimension_numbers<[1], [0], [0], [1], [0, 0, 1, 1], [], []>} : vector<1x128xf32>, vector<128x128xf32>, vector<1x128xf32> -> vector<1x128xf32>
    %cst_38 = arith.constant dense<0.000000e+00> : vector<1x128xf32>
    %31 = tpu.matmul %29, %22, %cst_38 {dimension_numbers = #tpu.dot_dimension_numbers<[1], [0], [0], [1], [0, 0, 1, 1], [], []>} : vector<1x128xf32>, vector<128x128xf32>, vector<1x128xf32> -> vector<1x128xf32>
    %32 = arith.mulf %30, %30 : vector<1x128xf32>
    %33 = arith.subf %31, %32 : vector<1x128xf32>
    %cst_39 = arith.constant 9.99999974E-6 : f32
    %34 = vector.broadcast %cst_39 : f32 to vector<1x128xf32>
    %35 = arith.addf %33, %34 : vector<1x128xf32>
    %36 = math.rsqrt %35 : vector<1x128xf32>
    %37 = arith.mulf %23, %36 : vector<1x128xf32>
    %38 = vector.broadcast %30 : vector<1x128xf32> to vector<32x128xf32>
    %39 = arith.subf %21, %38 : vector<32x128xf32>
    %40 = vector.broadcast %37 : vector<1x128xf32> to vector<32x128xf32>
    %41 = arith.mulf %39, %40 : vector<32x128xf32>
    %42 = vector.broadcast %24 : vector<1x128xf32> to vector<32x128xf32>
    %43 = arith.addf %41, %42 : vector<32x128xf32>
    %cst_40 = arith.constant 0.000000e+00 : f32
    %44 = vector.broadcast %cst_40 : f32 to vector<32x128xf32>
    %45 = arith.maximumf %43, %44 : vector<32x128xf32>
    %cst_41 = arith.constant 0.000000e+00 : f32
    %46 = vector.broadcast %cst_41 : f32 to vector<2x1x128xf32>
    %c0_42 = arith.constant 0 : index
    %c0_43 = arith.constant 0 : index
    %c0_44 = arith.constant 0 : index
    %47 = vector.load %arg11[%c0_42, %c0_43, %c0_44] : memref<2x18x128xf32, #tpu.memory_space<vmem>>, vector<2x1x128xf32>
    tpu.vector_store %arg11[%c0_42, %c0_43, %c0_44], %46 {strides = array<i32>} : memref<2x18x128xf32, #tpu.memory_space<vmem>>, vector<2x1x128xf32>,
    %c0_45 = arith.constant 0 : index
    %c17_46 = arith.constant 17 : index
    %c0_47 = arith.constant 0 : index
    %48 = vector.load %arg11[%c0_45, %c17_46, %c0_47] : memref<2x18x128xf32, #tpu.memory_space<vmem>>, vector<2x1x128xf32>
    tpu.vector_store %arg11[%c0_45, %c17_46, %c0_47], %46 {strides = array<i32>} : memref<2x18x128xf32, #tpu.memory_space<vmem>>, vector<2x1x128xf32>,
    %49 = vector.shape_cast %45 : vector<32x128xf32> to vector<2x16x128xf32>
    %c0_48 = arith.constant 0 : index
    %c1_49 = arith.constant 1 : index
    %c0_50 = arith.constant 0 : index
    %50 = vector.load %arg11[%c0_48, %c1_49, %c0_50] : memref<2x18x128xf32, #tpu.memory_space<vmem>>, vector<2x16x128xf32>
    tpu.vector_store %arg11[%c0_48, %c1_49, %c0_50], %49 {strides = array<i32>} : memref<2x18x128xf32, #tpu.memory_space<vmem>>, vector<2x16x128xf32>,
    %c0_51 = arith.constant 0 : index
    %c0_52 = arith.constant 0 : index
    %c0_53 = arith.constant 0 : index
    %51 = vector.load %arg11[%c0_51, %c0_52, %c0_53] : memref<2x18x128xf32, #tpu.memory_space<vmem>>, vector<2x16x128xf32>
    %52 = vector.shape_cast %51 : vector<2x16x128xf32> to vector<32x128xf32>
    %c0_54 = arith.constant 0 : index
    %c0_55 = arith.constant 0 : index
    %c0_56 = arith.constant 0 : index
    %53 = vector.load %arg2[%c0_54, %c0_55, %c0_56] : memref<3x128x64xf32, #tpu.memory_space<vmem>>, vector<1x128x64xf32>
    %54 = vector.shape_cast %53 : vector<1x128x64xf32> to vector<128x64xf32>
    %cst_57 = arith.constant dense<0.000000e+00> : vector<32x64xf32>
    %55 = tpu.matmul %52, %54, %cst_57 {dimension_numbers = #tpu.dot_dimension_numbers<[1], [0], [0], [1], [0, 0, 1, 1], [], []>} : vector<32x128xf32>, vector<128x64xf32>, vector<32x64xf32> -> vector<32x64xf32>
    %c0_58 = arith.constant 0 : index
    %c1_59 = arith.constant 1 : index
    %c0_60 = arith.constant 0 : index
    %56 = vector.load %arg11[%c0_58, %c1_59, %c0_60] : memref<2x18x128xf32, #tpu.memory_space<vmem>>, vector<2x16x128xf32>
    %57 = vector.shape_cast %56 : vector<2x16x128xf32> to vector<32x128xf32>
    %c1_61 = arith.constant 1 : index
    %c0_62 = arith.constant 0 : index
    %c0_63 = arith.constant 0 : index
    %58 = vector.load %arg2[%c1_61, %c0_62, %c0_63] : memref<3x128x64xf32, #tpu.memory_space<vmem>>, vector<1x128x64xf32>
    %59 = vector.shape_cast %58 : vector<1x128x64xf32> to vector<128x64xf32>
    %cst_64 = arith.constant dense<0.000000e+00> : vector<32x64xf32>
    %60 = tpu.matmul %57, %59, %cst_64 {dimension_numbers = #tpu.dot_dimension_numbers<[1], [0], [0], [1], [0, 0, 1, 1], [], []>} : vector<32x128xf32>, vector<128x64xf32>, vector<32x64xf32> -> vector<32x64xf32>
    %61 = arith.addf %55, %60 : vector<32x64xf32>
    %c0_65 = arith.constant 0 : index
    %c2_66 = arith.constant 2 : index
    %c0_67 = arith.constant 0 : index
    %62 = vector.load %arg11[%c0_65, %c2_66, %c0_67] : memref<2x18x128xf32, #tpu.memory_space<vmem>>, vector<2x16x128xf32>
    %63 = vector.shape_cast %62 : vector<2x16x128xf32> to vector<32x128xf32>
    %c2_68 = arith.constant 2 : index
    %c0_69 = arith.constant 0 : index
    %c0_70 = arith.constant 0 : index
    %64 = vector.load %arg2[%c2_68, %c0_69, %c0_70] : memref<3x128x64xf32, #tpu.memory_space<vmem>>, vector<1x128x64xf32>
    %65 = vector.shape_cast %64 : vector<1x128x64xf32> to vector<128x64xf32>
    %cst_71 = arith.constant dense<0.000000e+00> : vector<32x64xf32>
    %66 = tpu.matmul %63, %65, %cst_71 {dimension_numbers = #tpu.dot_dimension_numbers<[1], [0], [0], [1], [0, 0, 1, 1], [], []>} : vector<32x128xf32>, vector<128x64xf32>, vector<32x64xf32> -> vector<32x64xf32>
    %67 = arith.addf %61, %66 : vector<32x64xf32>
    %c0_72 = arith.constant 0 : index
    %c0_73 = arith.constant 0 : index
    %68 = vector.load %arg4[%c0_72, %c0_73] : memref<64x64xf32, #tpu.memory_space<vmem>>, vector<64x64xf32>
    %c0_74 = arith.constant 0 : index
    %c0_75 = arith.constant 0 : index
    %69 = vector.load %arg7[%c0_74, %c0_75] : memref<1x64xf32, #tpu.memory_space<vmem>>, vector<1x64xf32>
    %c0_76 = arith.constant 0 : index
    %c0_77 = arith.constant 0 : index
    %70 = vector.load %arg8[%c0_76, %c0_77] : memref<1x64xf32, #tpu.memory_space<vmem>>, vector<1x64xf32>
    %cst_78 = arith.constant dense<0.000000e+00> : vector<64xf32>
    %71 = vector.multi_reduction <add>, %67, %cst_78 [0] : vector<32x64xf32> to vector<64xf32>
    %72 = vector.shape_cast %71 : vector<64xf32> to vector<1x64xf32>
    %73 = arith.mulf %67, %67 : vector<32x64xf32>
    %cst_79 = arith.constant dense<0.000000e+00> : vector<64xf32>
    %74 = vector.multi_reduction <add>, %73, %cst_79 [0] : vector<32x64xf32> to vector<64xf32>
    %75 = vector.shape_cast %74 : vector<64xf32> to vector<1x64xf32>
    %cst_80 = arith.constant dense<0.000000e+00> : vector<1x64xf32>
    %76 = tpu.matmul %72, %68, %cst_80 {dimension_numbers = #tpu.dot_dimension_numbers<[1], [0], [0], [1], [0, 0, 1, 1], [], []>} : vector<1x64xf32>, vector<64x64xf32>, vector<1x64xf32> -> vector<1x64xf32>
    %cst_81 = arith.constant dense<0.000000e+00> : vector<1x64xf32>
    %77 = tpu.matmul %75, %68, %cst_81 {dimension_numbers = #tpu.dot_dimension_numbers<[1], [0], [0], [1], [0, 0, 1, 1], [], []>} : vector<1x64xf32>, vector<64x64xf32>, vector<1x64xf32> -> vector<1x64xf32>
    %78 = arith.mulf %76, %76 : vector<1x64xf32>
    %79 = arith.subf %77, %78 : vector<1x64xf32>
    %cst_82 = arith.constant 9.99999974E-6 : f32
    %80 = vector.broadcast %cst_82 : f32 to vector<1x64xf32>
    %81 = arith.addf %79, %80 : vector<1x64xf32>
    %82 = math.rsqrt %81 : vector<1x64xf32>
    %83 = arith.mulf %69, %82 : vector<1x64xf32>
    %84 = vector.broadcast %76 : vector<1x64xf32> to vector<32x64xf32>
    %85 = arith.subf %67, %84 : vector<32x64xf32>
    %86 = vector.broadcast %83 : vector<1x64xf32> to vector<32x64xf32>
    %87 = arith.mulf %85, %86 : vector<32x64xf32>
    %88 = vector.broadcast %70 : vector<1x64xf32> to vector<32x64xf32>
    %89 = arith.addf %87, %88 : vector<32x64xf32>
    %90 = vector.shape_cast %0 : vector<2x16x64xf32> to vector<32x64xf32>
    %91 = arith.addf %89, %90 : vector<32x64xf32>
    %cst_83 = arith.constant 0.000000e+00 : f32
    %92 = vector.broadcast %cst_83 : f32 to vector<32x64xf32>
    %93 = arith.maximumf %91, %92 : vector<32x64xf32>
    %c0_84 = arith.constant 0 : index
    %c0_85 = arith.constant 0 : index
    %94 = vector.load %arg9[%c0_84, %c0_85] : memref<32x64xf32, #tpu.memory_space<vmem>>, vector<32x64xf32>
    tpu.vector_store %arg9[%c0_84, %c0_85], %93 {strides = array<i32>} : memref<32x64xf32, #tpu.memory_space<vmem>>, vector<32x64xf32>,
    return
  }
}

</mosaic_0001>

<bundles_post_ra>
// kernel: tpu_custom_call.1
= control target key start
LH: loop header
LB: loop body
LE: loop exit
PB: predicated region body
PF: predicated region fallthrough
CT: control target
= control target key end

     0   :  { %vm42_vm0 = vcmask 523264   ;;  %vm37_vm1 = vcmask 516096   ;;  %v1939_v5 = vmov 0.0   ;;  %v1940_v10 = vmov 0.0|0.0   ;;  %s2459_s0 = inlined_call_operand.vmem [shape: f32[2,16,64], index: 0, kind: input, shape index: {}]   ;;  %s2460_s1 = inlined_call_operand.vmem [shape: f32[3,64,128], index: 1, kind: input, shape index: {}]   ;;  %s2461_s2 = inlined_call_operand.vmem [shape: f32[3,128,64], index: 2, kind: input, shape index: {}]   ;;  %s2462_s3 = inlined_call_operand.vmem [shape: f32[128,128], index: 3, kind: input, shape index: {}]   ;;  %s2463_s4 = inlined_call_operand.vmem [shape: f32[64,64], index: 4, kind: input, shape index: {}]   ;;  %s2464_s5 = inlined_call_operand.vmem [shape: f32[1,128], index: 5, kind: input, shape index: {}]   ;;  %s2465_s6 = inlined_call_operand.vmem [shape: f32[1,128], index: 6, kind: input, shape index: {}]   ;;  %s2466_s7 = inlined_call_operand.vmem [shape: f32[1,64], index: 7, kind: input, shape index: {}]   ;;  %s2467_s8 = inlined_call_operand.vmem [shape: f32[1,64], index: 8, kind: input, shape index: {}]   ;;  %s2468_s9 = inlined_call_operand.hbm [shape: f32[32,64], index: 9, kind: output, shape index: {}]  }
   0x1   :  { %v1173_v0 = vld [vmem:[%s2460_s1 + $0x40] sm:$0xff]  ;;  %v1174_v1 = vld [vmem:[%s2460_s1 + $0x48] sm:$0xff]  ;;  %v1175_v2 = vld [vmem:[%s2460_s1 + $0x50] sm:$0xff]  ;;  %38 = vst.msk [vmem:[#allocation2] sm:$0x1] %vm37_vm1, %v1939_v5  ;;  %1721 = vmatprep.subr.bf16.mxu1 %v1940_v10 }
   0x2   :  { %v1673_v3 = vpack.c.bf16 %v1174_v1, %v1173_v0  ;;  %v1176_v4 = vld [vmem:[%s2460_s1 + $0x58] sm:$0xff]  ;;  %39 = vst.msk [vmem:[#allocation2 + $0x18] sm:$0x1] %vm37_vm1, %v1939_v5  ;;  %40 = vst.msk [vmem:[#allocation2 + $0x11] sm:$0x1] %vm37_vm1, %v1939_v5  ;;  %v1177_v7 = vld [vmem:[%s2460_s1 + $0x60] sm:$0xff] }
   0x3   :  { %41 = vst.msk [vmem:[#allocation2 + $0x29] sm:$0x1] %vm37_vm1, %v1939_v5  ;;  %597 = vst [vmem:[#allocation3] sm:$0x1] %v1939_v5  ;;  %v1677_v6 = vpack.c.bf16 %v1176_v4, %v1175_v2  ;;  %v1178_v8 = vld [vmem:[%s2460_s1 + $0x68] sm:$0xff]  ;;  %v2024_v9 = vld [vmem:[%s2459_s0] sm:$0xff] }
   0x4   :  { %598 = vst [vmem:[#allocation3 + $0x18] sm:$0x1] %v1939_v5  ;;  %599 = vst [vmem:[#allocation3 + $0x11] sm:$0x1] %v1939_v5  ;;  %1674 = vmatprep.subr.bf16.mxu0 %v1673_v3  ;;  %v2032_v11 = vld [vmem:[%s2459_s0 + $0x8] sm:$0xff]  ;;  %v1681_v12 = vpack.c.bf16 %v1178_v8, %v1177_v7  ;;  %v2039_v13 = vld [vmem:[%s2459_s0 + $0x10] sm:$0xff] }
   0x5   :  { %600 = vst [vmem:[#allocation3 + $0x29] sm:$0x1] %v1939_v5  ;;  %43 = vst.msk [vmem:[#allocation2 + $0x1] sm:$0xff] %vm42_vm0, %v2024_v9  ;;  %1676 = vmatpush3.bf16.msra.mxu0 %v1673_v3  ;;  %v1179_v14 = vld [vmem:[%s2460_s1 + $0x70] sm:$0xff]  ;;  %v1180_v15 = vld [vmem:[%s2460_s1 + $0x78] sm:$0xff] }
   0x6   :  { %44 = vst.msk [vmem:[#allocation2 + $0x9] sm:$0xff] %vm42_vm0, %v2032_v11  ;;  %1678 = vmatprep.subr.bf16.mxu0 %v1677_v6  ;;  %45 = vst.msk [vmem:[#allocation2 + $0x19] sm:$0xff] %vm42_vm0, %v2039_v13  ;;  %v2052_v16 = vld [vmem:[%s2459_s0 + $0x18] sm:$0xff]  ;;  %v1685_v17 = vpack.c.bf16 %v1180_v15, %v1179_v14  ;;  %v51_v18 = vld [vmem:[%s2460_s1] sm:$0xff] }
   0x7   :  { %46 = vst.msk [vmem:[#allocation2 + $0x21] sm:$0xff] %vm42_vm0, %v2052_v16  ;;  %v380_v19 = vld [vmem:[%s2462_s3] sm:$0xff]  ;;  %v381_v20 = vld [vmem:[%s2462_s3 + $0x8] sm:$0xff]  ;;  %v382_v24 = vld [vmem:[%s2462_s3 + $0x10] sm:$0xff] }
   0x8   :  { %v52_v22 = vld [vmem:[%s2460_s1 + $0x8] sm:$0xff]  ;;  %v2068_v23 = vpack.c.bf16 %v381_v20, %v380_v19  ;;  %v383_v25 = vld [vmem:[%s2462_s3 + $0x18] sm:$0xff]  ;;  %v53_v27 = vld [vmem:[%s2460_s1 + $0x10] sm:$0xff] }
   0x9   :  { %1680 = vmatpush3.bf16.msra.mxu0 %v1677_v6  ;;  %v1689_v26 = vpack.c.bf16 %v52_v22, %v51_v18  ;;  %v2082_v28 = vpack.c.bf16 %v383_v25, %v382_v24  ;;  %v54_v29 = vld [vmem:[%s2460_s1 + $0x18] sm:$0xff]  ;;  %v384_v30 = vld [vmem:[%s2462_s3 + $0x20] sm:$0xff]  ;;  %v385_v31 = vld [vmem:[%s2462_s3 + $0x28] sm:$0xff] }
   0xa   :  { %1682 = vmatprep.subr.bf16.mxu0 %v1681_v12  ;;  %1723 = vmatpush3.bf16.msra.mxu1 %v2068_v23 }
   0xb   :  { %1724 = vmatprep.subr.bf16.mxu1 %v1940_v10 }
   0xc   :  { %v59_v21 = vld [vmem:[#allocation2 + $0x1] sm:$0xff] }
   0xd   :  { %1401 = vmatprep.mubr.msk.f32.mxu0 %vm42_vm0, %v59_v21  ;;  %1684 = vmatpush3.bf16.msra.mxu0 %v1681_v12 }
   0xe   :  { %1686 = vmatprep.subr.bf16.mxu0 %v1685_v17 }
   0xf   :  { %14 = vsyncpa [#allocation5], 0  ;;  %v60_v32 = vld [vmem:[#allocation2 + $0x9] sm:$0xff]  ;;  %1726 = vmatpush3.bf16.msra.mxu1 %v2082_v28  ;;  %v1693_v33 = vpack.c.bf16 %v54_v29, %v53_v27  ;;  %v61_v34 = vld [vmem:[#allocation2 + $0x19] sm:$0xff]  ;;  %v2095_v35 = vpack.c.bf16 %v385_v31, %v384_v30  ;;  %vm1941_vm2 = vmmov 0  }
  0x10   :  { %1727 = vmatprep.subr.bf16.mxu1 %v1940_v10  ;;  %v55_v36 = vld [vmem:[%s2460_s1 + $0x20] sm:$0xff]  ;;  %v56_v37 = vld [vmem:[%s2460_s1 + $0x28] sm:$0xff]  ;;  %v57_v41 = vld [vmem:[%s2460_s1 + $0x30] sm:$0xff]  ;;  %1483 = vmatprep.mubr.msk.f32.mxu1 %vm1941_vm2, %v1939_v5 }
  0x11   :  { %1688 = vmatpush3.bf16.msra.mxu0 %v1685_v17  ;;  %v62_v38 = vld [vmem:[#allocation2 + $0x21] sm:$0xff]  ;;  %v1697_v39 = vpack.c.bf16 %v56_v37, %v55_v36  ;;  %v58_v42 = vld [vmem:[%s2460_s1 + $0x38] sm:$0xff]  ;;  %v1191_v47 = vld [vmem:[%s2460_s1 + $0x90] sm:$0xff] }
  0x12   :  { %1690 = vmatprep.subr.bf16.mxu0 %v1689_v26  ;;  %v47_v40 = vld [vmem:[#allocation2] sm:$0xff]  ;;  %v1701_v43 = vpack.c.bf16 %v58_v42, %v57_v41  ;;  %v1190_v45 = vld [vmem:[%s2460_s1 + $0x88] sm:$0xff]  ;;  %v1192_v48 = vld [vmem:[%s2460_s1 + $0x98] sm:$0xff] }
  0x13   :  { %1729 = vmatpush3.bf16.msra.mxu1 %v2095_v35  ;;  %v1189_v44 = vld [vmem:[%s2460_s1 + $0x80] sm:$0xff]  ;;  %v48_v49 = vld [vmem:[#allocation2 + $0x8] sm:$0xff]  ;;  %v1709_v50 = vpack.c.bf16 %v1192_v48, %v1191_v47  ;;  %v49_v51 = vld [vmem:[#allocation2 + $0x18] sm:$0xff] }
  0x14   :  { %1402 = vmatmul.mubr.msk.f32.vlgmr.msra.gmra.mrb[0].mxu0 %vm42_vm0, %v60_v32  ;;  %1730 = vmatprep.subr.bf16.mxu1 %v1940_v10  ;;  %v1705_v46 = vpack.c.bf16 %v1190_v45, %v1189_v44  ;;  %v1193_v52 = vld [vmem:[%s2460_s1 + $0xa0] sm:$0xff]  ;;  %v1194_v53 = vld [vmem:[%s2460_s1 + $0xa8] sm:$0xff]  ;;  %v1195_v57 = vld [vmem:[%s2460_s1 + $0xb0] sm:$0xff] }
  0x15   :  { %1692 = vmatpush3.bf16.msra.mxu0 %v1689_v26  ;;  %1404 = vmatprep.mubr.msk.f32.mxu0 %vm42_vm0, %v61_v34  ;;  %v50_v54 = vld [vmem:[#allocation2 + $0x20] sm:$0xff]  ;;  %v1713_v55 = vpack.c.bf16 %v1194_v53, %v1193_v52  ;;  %v1196_v58 = vld [vmem:[%s2460_s1 + $0xb8] sm:$0xff]  ;;  %v267_v60 = vld [vmem:[#allocation2 + $0xa] sm:$0xff] }
  0x16   :  { %1694 = vmatprep.subr.bf16.mxu0 %v1693_v33  ;;  %v266_v56 = vld [vmem:[#allocation2 + $0x2] sm:$0xff]  ;;  %v1717_v59 = vpack.c.bf16 %v1196_v58, %v1195_v57  ;;  %v268_v61 = vld [vmem:[#allocation2 + $0x1a] sm:$0xff]  ;;  %v386_v63 = vld [vmem:[%s2462_s3 + $0x30] sm:$0xff] }
  0x17   :  { %v269_v62 = vld [vmem:[#allocation2 + $0x22] sm:$0xff]  ;;  %v387_v0 = vld [vmem:[%s2462_s3 + $0x38] sm:$0xff]  ;;  %v390_v6 = vld [vmem:[%s2462_s3 + $0x50] sm:$0xff] }
  0x18   :  { %1405 = vmatmul.mubr.msk.f32.gmra.mrb[2].mxu0 %vm42_vm0, %v62_v38  ;;  %v1731_v1 = vpack.c.bf16 %v387_v0, %v386_v63  ;;  %v388_v2 = vld [vmem:[%s2462_s3 + $0x40] sm:$0xff]  ;;  %v389_v3 = vld [vmem:[%s2462_s3 + $0x48] sm:$0xff]  ;;  %v391_v7 = vld [vmem:[%s2462_s3 + $0x58] sm:$0xff] }
  0x19   :  { %1696 = vmatpush3.bf16.msra.mxu0 %v1693_v33  ;;  %1423 = vmatprep.mubr.msk.f32.mxu0 %vm42_vm0, %v47_v40  ;;  %v1734_v4 = vpack.c.bf16 %v389_v3, %v388_v2  ;;  %v1737_v8 = vpack.c.bf16 %v391_v7, %v390_v6  ;;  %v392_v12 = vld [vmem:[%s2462_s3 + $0x60] sm:$0xff]  ;;  %v393_v14 = vld [vmem:[%s2462_s3 + $0x68] sm:$0xff]  ;;  %v394_v17 = vld [vmem:[%s2462_s3 + $0x70] sm:$0xff] }
  0x1a   :  { %1698 = vmatprep.subr.bf16.mxu0 %v1697_v39  ;;  %1732 = vmatpush3.bf16.msra.mxu1 %v1731_v1  ;;  %v1740_v15 = vpack.c.bf16 %v393_v14, %v392_v12  ;;  %v395_v18 = vld [vmem:[%s2462_s3 + $0x78] sm:$0xff]  ;;  %v1203_v47 = vld [vmem:[%s2461_s2 + $0x88] sm:$0xff]  ;;  %v609_v52 = vld [vmem:[%s2461_s2] sm:$0xff] }
  0x1b   :  { %1733 = vmatprep.subr.bf16.mxu1 %v1940_v10  ;;  %v1743_v19 = vpack.c.bf16 %v395_v18, %v394_v17  ;;  %v610_v53 = vld [vmem:[%s2461_s2 + $0x8] sm:$0xff]  ;;  %v611_v58 = vld [vmem:[%s2461_s2 + $0x10] sm:$0xff]  ;;  %v613_v0 = vld [vmem:[%s2461_s2 + $0x20] sm:$0xff] }
  0x1c   :  { %v1210_v3 = vld [vmem:[%s2461_s2 + $0xc0] sm:$0xff]  ;;  %v615_v7 = vld [vmem:[%s2461_s2 + $0x30] sm:$0xff] }
  0x1d   :  { %1700 = vmatpush3.bf16.msra.mxu0 %v1697_v39  ;;  %v1212_v14 = vld [vmem:[%s2461_s2 + $0xd0] sm:$0xff]  ;;  %v617_v18 = vld [vmem:[%s2461_s2 + $0x40] sm:$0xff] }
  0x1e   :  { %1702 = vmatprep.subr.bf16.mxu0 %v1701_v43  ;;  %1735 = vmatpush3.bf16.msra.mxu1 %v1734_v4 }
  0x1f   :  { %1736 = vmatprep.subr.bf16.mxu1 %v1940_v10 }
  0x21   :  { %1704 = vmatpush3.bf16.msra.mxu0 %v1701_v43 }
  0x22   :  { %1706 = vmatprep.subr.bf16.mxu0 %v1705_v46  ;;  %1738 = vmatpush3.bf16.msra.mxu1 %v1737_v8 }
  0x23   :  { %1739 = vmatprep.subr.bf16.mxu1 %v1940_v10 }
  0x24   :  { %1424 = vmatmul.mubr.msk.f32.vlgmr.msra.gmra.mrb[0].mxu0 %vm42_vm0, %v48_v49  ;;  %v1204_v49 = vld [vmem:[%s2461_s2 + $0x90] sm:$0xff] }
  0x25   :  { %1708 = vmatpush3.bf16.msra.mxu0 %v1705_v46  ;;  %1426 = vmatprep.mubr.msk.f32.mxu0 %vm42_vm0, %v49_v51  ;;  %v1202_v46 = vld [vmem:[%s2461_s2 + $0x80] sm:$0xff] }
  0x26   :  { %1710 = vmatprep.subr.bf16.mxu0 %v1709_v50  ;;  %1741 = vmatpush3.bf16.msra.mxu1 %v1740_v15  ;;  %v1769_v48 = vpack.c.bf16 %v1203_v47, %v1202_v46 }
  0x27   :  { %1742 = vmatprep.subr.bf16.mxu1 %v1940_v10 }
  0x28   :  { %1427 = vmatmul.mubr.msk.f32.gmra.mrb[2].mxu0 %vm42_vm0, %v50_v54  ;;  %v1801_v54 = vpack.c.bf16 %v610_v53, %v609_v52 }
  0x29   :  { %1712 = vmatpush3.bf16.msra.mxu0 %v1709_v50  ;;  %1445 = vmatprep.mubr.msk.f32.mxu0 %vm42_vm0, %v266_v56  ;;  %v1205_v50 = vld [vmem:[%s2461_s2 + $0x98] sm:$0xff]  ;;  %v1207_v56 = vld [vmem:[%s2461_s2 + $0xa8] sm:$0xff] }
  0x2a   :  { %1714 = vmatprep.subr.bf16.mxu0 %v1713_v55  ;;  %1744 = vmatpush3.bf16.msra.mxu1 %v1743_v19  ;;  %v1773_v51 = vpack.c.bf16 %v1205_v50, %v1204_v49 }
  0x2b   :  { %1745 = vmatprep.subr.bf16.mxu1 %v1940_v10 }
  0x2d   :  { %1716 = vmatpush3.bf16.msra.mxu0 %v1713_v55  ;;  %v1206_v55 = vld [vmem:[%s2461_s2 + $0xa0] sm:$0xff] }
  0x2e   :  { %1718 = vmatprep.subr.bf16.mxu0 %v1717_v59  ;;  %v1777_v57 = vpack.c.bf16 %v1207_v56, %v1206_v55 }
  0x31   :  { %1720 = vmatpush3.bf16.msra.mxu0 %v1717_v59  ;;  %v612_v59 = vld [vmem:[%s2461_s2 + $0x18] sm:$0xff] }
  0x32   :  { %1802 = vmatprep.subr.bf16.mxu0 %v1801_v54 }
  0x34   :  { %1446 = vmatmul.mubr.msk.f32.vlgmr.msra.gmra.mrb[0].mxu0 %vm42_vm0, %v267_v60  ;;  %v1805_v60 = vpack.c.bf16 %v612_v59, %v611_v58  ;;  %v396_v58 = vld [vmem:[%s2464_s5] sm:$0x1] }
  0x35   :  { %1448 = vmatprep.mubr.msk.f32.mxu0 %vm42_vm0, %v268_v61  ;;  %1804 = vmatpush3.bf16.msra.mxu0 %v1801_v54  ;;  %v1208_v61 = vld [vmem:[%s2461_s2 + $0xb0] sm:$0xff] }
  0x36   :  { %1806 = vmatprep.subr.bf16.mxu0 %v1805_v60 }
  0x38   :  { %1449 = vmatmul.mubr.msk.f32.gmra.mrb[2].mxu0 %vm42_vm0, %v269_v62  ;;  %v1209_v62 = vld [vmem:[%s2461_s2 + $0xb8] sm:$0xff] }
  0x39   :  { %v1781_v63 = vpack.c.bf16 %v1209_v62, %v1208_v61  ;;  %1808 = vmatpush3.bf16.msra.mxu0 %v1805_v60 }
 0x107   :  { %v2183_v20 = vpop.f32.mrb[0].mxu0 }
 0x108   :  { %v408_v21 = vmul.f32 %v2183_v20, %v2183_v20  ;;  %v2187_v22 = vpop.f32.mrb[1].mxu0 }
 0x109   :  { %v398_v24 = vadd.f32 %v2183_v20, %v2187_v22  ;;  %v407_v25 = vmul.f32 %v2187_v22, %v2187_v22 }
 0x10b   :  { %v411_v26 = vadd.f32 %v408_v21, %v407_v25  ;;  %v2193_v27 = vpop.f32.mrb[2].mxu0  ;;  %v1215_v25 = vld [vmem:[%s2461_s2 + $0xe8] sm:$0xff] }
 0x10c   :  { %v2195_v29 = vpop.f32.mrb[3].mxu0  ;;  %v410_v32 = vmul.f32 %v2193_v27, %v2193_v27 }
 0x10d   :  { %v399_v30 = vadd.f32 %v398_v24, %v2195_v29  ;;  %v409_v31 = vmul.f32 %v2195_v29, %v2195_v29  ;;  %v1214_v24 = vld [vmem:[%s2461_s2 + $0xe0] sm:$0xff] }
 0x10f   :  { %v400_v33 = vadd.f32 %v2193_v27, %v399_v30  ;;  %v412_v34 = vadd.f32 %v411_v26, %v409_v31  ;;  %v1793_v26 = vpack.c.bf16 %v1215_v25, %v1214_v24  ;;  %v619_v30 = vld [vmem:[%s2461_s2 + $0x50] sm:$0xff]  ;;  %v620_v31 = vld [vmem:[%s2461_s2 + $0x58] sm:$0xff] }
 0x111   :  { %v401_v36 = vrot.slane %v400_v33, 4  ;;  %v413_v37 = vadd.f32 %v412_v34, %v410_v32  ;;  %v1821_v32 = vpack.c.bf16 %v620_v31, %v619_v30  ;;  %v1217_v34 = vld [vmem:[%s2461_s2 + $0xf8] sm:$0xff] }
 0x112   :  { %v1225_v30 = vld [vmem:[%s2461_s2 + $0x138] sm:$0xff] }
 0x113   :  { %v402_v38 = vadd.f32 %v401_v36, %v400_v33  ;;  %v414_v43 = vrot.slane %v413_v37, 4  ;;  %v1216_v33 = vld [vmem:[%s2461_s2 + $0xf0] sm:$0xff] }
 0x114   :  { %v1797_v36 = vpack.c.bf16 %v1217_v34, %v1216_v33  ;;  %v1226_v33 = vld [vmem:[%s2461_s2 + $0x140] sm:$0xff]  ;;  %v1227_v34 = vld [vmem:[%s2461_s2 + $0x148] sm:$0xff] }
 0x115   :  { %v403_v39 = vrot.slane %v402_v38, 2  ;;  %v415_v44 = vadd.f32 %v414_v43, %v413_v37  ;;  %v621_v37 = vld [vmem:[%s2461_s2 + $0x60] sm:$0xff] }
 0x116   :  { %v1218_v43 = vld [vmem:[%s2461_s2 + $0x100] sm:$0xff] }
 0x117   :  { %v404_v40 = vadd.f32 %v403_v39, %v402_v38  ;;  %v622_v38 = vld [vmem:[%s2461_s2 + $0x68] sm:$0xff] }
 0x118   :  { %v1825_v39 = vpack.c.bf16 %v622_v38, %v621_v37  ;;  %v1228_v37 = vld [vmem:[%s2461_s2 + $0x150] sm:$0xff]  ;;  %v1229_v38 = vld [vmem:[%s2461_s2 + $0x158] sm:$0xff] }
 0x119   :  { %v405_v41 = vrot.slane %v404_v40, 1 }
 0x11b   :  { %v406_v42 = vadd.f32 %v405_v41, %v404_v40  ;;  %v623_v40 = vld [vmem:[%s2461_s2 + $0x70] sm:$0xff]  ;;  %v624_v41 = vld [vmem:[%s2461_s2 + $0x78] sm:$0xff] }
 0x11d   :  { %1484 = vmatmul.mubr.f32.vlgmr.msra.gmra.mrb[0].mxu1 %v406_v42  ;;  %v1829_v42 = vpack.c.bf16 %v624_v41, %v623_v40  ;;  %v1230_v40 = vld [vmem:[%s2461_s2 + $0x160] sm:$0xff]  ;;  %v1231_v41 = vld [vmem:[%s2461_s2 + $0x168] sm:$0xff] }
 0x11e   :  { %1747 = vmatpush3.bf16.msra.mxu1 %v2068_v23  ;;  %1518 = vmatprep.mubr.msk.f32.mxu1 %vm1941_vm2, %v1939_v5  ;;  %v416_v23 = vrot.slane %v415_v44, 2 }
 0x11f   :  { %1748 = vmatprep.subr.bf16.mxu1 %v1940_v10 }
 0x120   :  { %v417_v45 = vadd.f32 %v416_v23, %v415_v44  ;;  %v1219_v44 = vld [vmem:[%s2461_s2 + $0x108] sm:$0xff] }
 0x121   :  { %v1833_v23 = vpack.c.bf16 %v1219_v44, %v1218_v43  ;;  %v1232_v43 = vld [vmem:[%s2461_s2 + $0x170] sm:$0xff]  ;;  %v1233_v44 = vld [vmem:[%s2461_s2 + $0x178] sm:$0xff] }
 0x122   :  { %1750 = vmatpush3.bf16.msra.mxu1 %v2082_v28  ;;  %v418_v28 = vrot.slane %v417_v45, 1 }
 0x123   :  { %1751 = vmatprep.subr.bf16.mxu1 %v1940_v10 }
 0x126   :  { %1753 = vmatpush3.bf16.msra.mxu1 %v2095_v35  ;;  %v419_v35 = vadd.f32 %v418_v28, %v417_v45  ;;  %v565_v45 = vlaneseq }
 0x127   :  { %1754 = vmatprep.subr.bf16.mxu1 %v1940_v10 }
 0x128   :  { %v566_v28 = vshrl.u32 %v565_v45, 7 }
 0x12a   :  { %1756 = vmatpush3.bf16.msra.mxu1 %v1731_v1  ;;  %v614_v1 = vld [vmem:[%s2461_s2 + $0x28] sm:$0xff] }
 0x12b   :  { %1757 = vmatprep.subr.bf16.mxu1 %v1940_v10  ;;  %v1809_v2 = vpack.c.bf16 %v614_v1, %v613_v0 }
 0x12d   :  { %1810 = vmatprep.subr.bf16.mxu0 %v1809_v2 }
 0x12e   :  { %1759 = vmatpush3.bf16.msra.mxu1 %v1734_v4  ;;  %v1211_v4 = vld [vmem:[%s2461_s2 + $0xc8] sm:$0xff]  ;;  %1812 = vmatpush3.bf16.msra.mxu0 %v1809_v2 }
 0x12f   :  { %1760 = vmatprep.subr.bf16.mxu1 %v1940_v10  ;;  %v1785_v6 = vpack.c.bf16 %v1211_v4, %v1210_v3 }
 0x132   :  { %1762 = vmatpush3.bf16.msra.mxu1 %v1737_v8  ;;  %v616_v8 = vld [vmem:[%s2461_s2 + $0x38] sm:$0xff] }
 0x133   :  { %1763 = vmatprep.subr.bf16.mxu1 %v1940_v10  ;;  %v1813_v12 = vpack.c.bf16 %v616_v8, %v615_v7  ;;  %v1220_v8 = vld [vmem:[%s2461_s2 + $0x110] sm:$0xff] }
 0x135   :  { %1814 = vmatprep.subr.bf16.mxu0 %v1813_v12 }
 0x136   :  { %1765 = vmatpush3.bf16.msra.mxu1 %v1740_v15  ;;  %v1213_v15 = vld [vmem:[%s2461_s2 + $0xd8] sm:$0xff]  ;;  %1816 = vmatpush3.bf16.msra.mxu0 %v1813_v12 }
 0x137   :  { %1766 = vmatprep.subr.bf16.mxu1 %v1940_v10  ;;  %v1789_v17 = vpack.c.bf16 %v1213_v15, %v1212_v14  ;;  %v1221_v12 = vld [vmem:[%s2461_s2 + $0x118] sm:$0xff] }
 0x13a   :  { %1768 = vmatpush3.bf16.msra.mxu1 %v1743_v19  ;;  %v618_v19 = vld [vmem:[%s2461_s2 + $0x48] sm:$0xff] }
 0x13b   :  { %1770 = vmatprep.subr.bf16.mxu1 %v1769_v48  ;;  %v1817_v21 = vpack.c.bf16 %v618_v19, %v617_v18  ;;  %v1222_v18 = vld [vmem:[%s2461_s2 + $0x120] sm:$0xff]  ;;  %v1223_v19 = vld [vmem:[%s2461_s2 + $0x128] sm:$0xff] }
 0x13c   :  { %v1841_v24 = vpack.c.bf16 %v1223_v19, %v1222_v18 }
 0x13d   :  { %1519 = vmatmul.mubr.f32.vlgmr.msra.gmra.mrb[2].mxu1 %v419_v35  ;;  %1818 = vmatprep.subr.bf16.mxu0 %v1817_v21  ;;  %v2318_v35 = vsub.s32 0, %v566_v28 }
 0x13e   :  { %1772 = vmatpush3.bf16.msra.mxu1 %v1769_v48  ;;  %1820 = vmatpush3.bf16.msra.mxu0 %v1817_v21 }
 0x13f   :  { %1774 = vmatprep.subr.bf16.mxu1 %v1773_v51  ;;  %1822 = vmatprep.subr.bf16.mxu0 %v1821_v32 }
 0x142   :  { %1776 = vmatpush3.bf16.msra.mxu1 %v1773_v51  ;;  %1824 = vmatpush3.bf16.msra.mxu0 %v1821_v32 }
 0x143   :  { %1778 = vmatprep.subr.bf16.mxu1 %v1777_v57  ;;  %1826 = vmatprep.subr.bf16.mxu0 %v1825_v39 }
 0x146   :  { %1780 = vmatpush3.bf16.msra.mxu1 %v1777_v57  ;;  %1828 = vmatpush3.bf16.msra.mxu0 %v1825_v39  ;;  %v1853_v39 = vpack.c.bf16 %v1229_v38, %v1228_v37 }
 0x147   :  { %1782 = vmatprep.subr.bf16.mxu1 %v1781_v63  ;;  %1830 = vmatprep.subr.bf16.mxu0 %v1829_v42 }
 0x14a   :  { %1784 = vmatpush3.bf16.msra.mxu1 %v1781_v63  ;;  %1832 = vmatpush3.bf16.msra.mxu0 %v1829_v42  ;;  %v1857_v42 = vpack.c.bf16 %v1231_v41, %v1230_v40 }
 0x14b   :  { %1786 = vmatprep.subr.bf16.mxu1 %v1785_v6  ;;  %1834 = vmatprep.subr.bf16.mxu0 %v1833_v23 }
 0x14e   :  { %1788 = vmatpush3.bf16.msra.mxu1 %v1785_v6 }
 0x14f   :  { %1790 = vmatprep.subr.bf16.mxu1 %v1789_v17 }
 0x152   :  { %1792 = vmatpush3.bf16.msra.mxu1 %v1789_v17  ;;  %v1837_v17 = vpack.c.bf16 %v1221_v12, %v1220_v8 }
 0x153   :  { %1794 = vmatprep.subr.bf16.mxu1 %v1793_v26 }
 0x156   :  { %1796 = vmatpush3.bf16.msra.mxu1 %v1793_v26  ;;  %v1224_v26 = vld [vmem:[%s2461_s2 + $0x130] sm:$0xff] }
 0x157   :  { %1798 = vmatprep.subr.bf16.mxu1 %v1797_v36  ;;  %v1845_v32 = vpack.c.bf16 %v1225_v30, %v1224_v26 }
 0x15a   :  { %1800 = vmatpush3.bf16.msra.mxu1 %v1797_v36  ;;  %v1849_v36 = vpack.c.bf16 %v1227_v34, %v1226_v33 }
 0x15b   :  { %1865 = vmatprep.subr.bf16.mxu1 %v1940_v10 }
 0x1f0   :  { %v486_v46 = vpop.f32.mrb[0].mxu1 }
 0x1f1   :  { %v568_v47 = vrot.slane %v486_v46, %v2318_v35  ;;  %v1485_v48 = vpop.f32.mrb[1].mxu1  ;;  %v560_v53 = vmul.f32 %v486_v46, %v486_v46 }
 0x1f2   :  { %v927_v48 = vld [vmem:[%s2463_s4 + $0x8] sm:$0xff] }
 0x1f3   :  { %v569_v49 = vsub.f32 %v2187_v22, %v568_v47  ;;  %v570_v50 = vsub.f32 %v2183_v20, %v568_v47  ;;  %v571_v51 = vsub.f32 %v2195_v29, %v568_v47  ;;  %v572_v52 = vsub.f32 %v2193_v27, %v568_v47  ;;  %v1201_v20 = vld [vmem:[%s2465_s6] ss:$0 sm:$0xff] }
 0x1f4   :  { %v926_v47 = vld [vmem:[%s2463_s4] sm:$0xff] }
 0x210   :  { %v556_v54 = vpop.f32.mrb[2].mxu1 }
 0x211   :  { %v561_v55 = vsub.f32 %v556_v54, %v560_v53  ;;  %v1520_v56 = vpop.f32.mrb[3].mxu1  ;;  %v930_v53 = vld [vmem:[%s2463_s4 + $0x20] sm:$0xff]  ;;  %v931_v54 = vld [vmem:[%s2463_s4 + $0x28] sm:$0xff] }
 0x212   :  { %v932_v56 = vld [vmem:[%s2463_s4 + $0x30] sm:$0xff] }
 0x213   :  { %v562_v57 = vadd.f32 1e-05, %v561_v55  ;;  %v1872_v55 = vpack.c.bf16 %v931_v54, %v930_v53 }
 0x215   :  { %1911 = vrsqrt.f32 %v562_v57  ;;  %v933_v57 = vld [vmem:[%s2463_s4 + $0x38] sm:$0xff] }
 0x21f   :  { %v1912_v59 = vpop.eup %1911 }
 0x220   :  { %v564_v60 = vmul.f32 %v1912_v59, %v396_v58  ;;  %v1875_v58 = vpack.c.bf16 %v933_v57, %v932_v56 }
 0x222   :  { %v577_v22 = vrot.slane %v564_v60, %v2318_v35 }
 0x224   :  { %v579_v29 = vmul.f32 %v577_v22, %v569_v49  ;;  %v580_v27 = vmul.f32 %v577_v22, %v570_v50  ;;  %v581_v61 = vmul.f32 %v577_v22, %v571_v51  ;;  %v582_v62 = vmul.f32 %v577_v22, %v572_v52  ;;  %v928_v50 = vld [vmem:[%s2463_s4 + $0x10] sm:$0xff]  ;;  %v929_v51 = vld [vmem:[%s2463_s4 + $0x18] sm:$0xff] }
 0x225   :  { %v1866_v49 = vpack.c.bf16 %v927_v48, %v926_v47  ;;  %v1869_v52 = vpack.c.bf16 %v929_v51, %v928_v50  ;;  %v934_v51 = vld [vmem:[%s2466_s7] sm:$0x1]  ;;  %s1942_s7 = smov [#allocation4]  }
 0x226   :  { %v589_v63 = vadd.f32 %v1201_v20, %v579_v29  ;;  %v590_v0 = vadd.f32 %v1201_v20, %v580_v27  ;;  %v591_v1 = vadd.f32 %v1201_v20, %v581_v61  ;;  %v592_v2 = vadd.f32 %v1201_v20, %v582_v62  ;;  %s1162_s24 = sshll.u32 %s1942_s7, 4  ;;  %s1163_s24 = int_to_ptr.vmem [resolvable:$true] %s1162_s24 }
 0x227   :  { %p1920_p1 = scmp.lt.s32.totalorder %s1163_s24, %s1163_s24 }
 0x228   :  { %v593_v3 = vmax.f32 %v589_v63, 0.0  ;;  %v594_v4 = vmax.f32 %v590_v0, 0.0  ;;  %v595_v6 = vmax.f32 %v591_v1, 0.0  ;;  %v596_v7 = vmax.f32 %v592_v2, 0.0 }
 0x22a   :  { %601 = vst [vmem:[#allocation3 + $0x1] sm:$0xff] %v593_v3  ;;  %602 = vst [vmem:[#allocation3 + $0x9] sm:$0xff] %v594_v4  ;;  %1553 = vmatprep.mubr.f32.mxu1 %v593_v3 }
 0x22b   :  { %603 = vst [vmem:[#allocation3 + $0x19] sm:$0xff] %v595_v6  ;;  %604 = vst [vmem:[#allocation3 + $0x21] sm:$0xff] %v596_v7  ;;  %1554 = vmatmul.mubr.f32.vlgmr.msra.gmra.mrb[4].mxu1 %v594_v4 }
 0x22c   :  { %1556 = vmatprep.mubr.f32.mxu1 %v595_v6  ;;  %1867 = vmatpush3.bf16.msra.mxu1 %v1866_v49 }
 0x22d   :  { %1868 = vmatprep.subr.bf16.mxu1 %v1940_v10 }
 0x22f   :  { %1557 = vmatmul.mubr.f32.gmra.mrb[6].mxu1 %v596_v7 }
 0x230   :  { %1651 = vmatprep.mubr.msk.f32.mxu1 %vm1941_vm2, %v1939_v5  ;;  %1870 = vmatpush3.bf16.msra.mxu1 %v1869_v52 }
 0x231   :  { %v605_v14 = vld [vmem:[#allocation3] sm:$0xff]  ;;  %v606_v15 = vld [vmem:[#allocation3 + $0x8] sm:$0xff]  ;;  %1871 = vmatprep.subr.bf16.mxu1 %v1940_v10 }
 0x232   :  { %1591 = vmatprep.mubr.f32.mxu0 %v605_v14  ;;  %v607_v21 = vld [vmem:[#allocation3 + $0x18] sm:$0xff]  ;;  %v608_v25 = vld [vmem:[#allocation3 + $0x20] sm:$0xff]  ;;  %v817_v45 = vld [vmem:[#allocation3 + $0xa] sm:$0xff] }
 0x233   :  { %1592 = vmatmul.mubr.f32.vlgmr.msra.gmra.mrb[4].mxu0 %v606_v15  ;;  %v816_v31 = vld [vmem:[#allocation3 + $0x2] sm:$0xff]  ;;  %v818_v28 = vld [vmem:[#allocation3 + $0x1a] sm:$0xff] }
 0x234   :  { %1836 = vmatpush3.bf16.msra.mxu0 %v1833_v23  ;;  %1594 = vmatprep.mubr.f32.mxu0 %v607_v21  ;;  %v1861_v23 = vpack.c.bf16 %v1233_v44, %v1232_v43  ;;  %v819_v46 = vld [vmem:[#allocation3 + $0x22] sm:$0xff] }
 0x235   :  { %1838 = vmatprep.subr.bf16.mxu0 %v1837_v17  ;;  %1873 = vmatpush3.bf16.msra.mxu1 %v1872_v55 }
 0x236   :  { %1874 = vmatprep.subr.bf16.mxu1 %v1940_v10 }
 0x237   :  { %1595 = vmatmul.mubr.f32.gmra.mrb[6].mxu0 %v608_v25 }
 0x238   :  { %1840 = vmatpush3.bf16.msra.mxu0 %v1837_v17  ;;  %1629 = vmatprep.mubr.f32.mxu0 %v816_v31 }
 0x239   :  { %1842 = vmatprep.subr.bf16.mxu0 %v1841_v24  ;;  %1876 = vmatpush3.bf16.msra.mxu1 %v1875_v58 }
 0x23a   :  { %1877 = vmatprep.subr.bf16.mxu1 %v1940_v10 }
 0x23c   :  { %1844 = vmatpush3.bf16.msra.mxu0 %v1841_v24 }
 0x23d   :  { %1846 = vmatprep.subr.bf16.mxu0 %v1845_v32 }
 0x240   :  { %1848 = vmatpush3.bf16.msra.mxu0 %v1845_v32 }
 0x241   :  { %1850 = vmatprep.subr.bf16.mxu0 %v1849_v36 }
 0x244   :  { %1852 = vmatpush3.bf16.msra.mxu0 %v1849_v36 }
 0x245   :  { %1854 = vmatprep.subr.bf16.mxu0 %v1853_v39 }
 0x248   :  { %1856 = vmatpush3.bf16.msra.mxu0 %v1853_v39 }
 0x249   :  { %1858 = vmatprep.subr.bf16.mxu0 %v1857_v42 }
 0x24c   :  { %1860 = vmatpush3.bf16.msra.mxu0 %v1857_v42 }
 0x24d   :  { %1862 = vmatprep.subr.bf16.mxu0 %v1861_v23 }
 0x250   :  { %1864 = vmatpush3.bf16.msra.mxu0 %v1861_v23 }
 0x253   :  { %1630 = vmatmul.mubr.f32.vlgmr.msra.gmra.mrb[4].mxu0 %v817_v45 }
 0x254   :  { %1632 = vmatprep.mubr.f32.mxu0 %v818_v28 }
 0x257   :  { %1633 = vmatmul.mubr.f32.gmra.mrb[6].mxu0 %v819_v46 }
 0x2fe   :  { %v1555_v59 = vpop.f32.mrb[4].mxu1 }
 0x2ff   :  { %v712_v60 = vpop.f32.mrb[5].mxu1 }
 0x302   :  { %v1558_v22 = vpop.f32.mrb[6].mxu1 }
 0x303   :  { %v722_v20 = vpop.f32.mrb[7].mxu1 }
 0x326   :  { %v1631_v29 = vpop.f32.mrb[4].mxu0 }
 0x327   :  { %v2404_v27 = vadd.f32 %v1631_v29, %v1555_v59  ;;  %v903_v61 = vpop.f32.mrb[5].mxu0 }
 0x328   :  { %v2406_v62 = vadd.f32 %v903_v61, %v712_v60 }
 0x329   :  { %v950_v63 = vmul.f32 %v2404_v27, %v2404_v27  ;;  %v937_v0 = vsel %vm42_vm0, %v2404_v27, 0.0 }
 0x32a   :  { %v936_v1 = vsel %vm42_vm0, %v2406_v62, 0.0  ;;  %v949_v2 = vmul.f32 %v2406_v62, %v2406_v62  ;;  %v1634_v3 = vpop.f32.mrb[6].mxu0 }
 0x32b   :  { %v1891_v4 = vadd.f32 %v1634_v3, %v1558_v22  ;;  %v913_v6 = vpop.f32.mrb[7].mxu0  ;;  %v954_v7 = vsel %vm42_vm0, %v950_v63, 0.0  ;;  %v938_v14 = vadd.f32 %v937_v0, %v936_v1 }
 0x32c   :  { %v953_v8 = vsel %vm42_vm0, %v949_v2, 0.0  ;;  %v1892_v12 = vadd.f32 %v913_v6, %v722_v20 }
 0x32d   :  { %v955_v18 = vadd.f32 %v954_v7, %v953_v8  ;;  %v941_v21 = vsel %vm42_vm0, %v1891_v4, 0.0  ;;  %v952_v24 = vmul.f32 %v1891_v4, %v1891_v4 }
 0x32e   :  { %v939_v15 = vsel %vm42_vm0, %v1892_v12, 0.0  ;;  %v951_v17 = vmul.f32 %v1892_v12, %v1892_v12 }
 0x32f   :  { %v940_v19 = vadd.f32 %v939_v15, %v938_v14  ;;  %v958_v32 = vsel %vm42_vm0, %v952_v24, 0.0 }
 0x330   :  { %v956_v25 = vsel %vm42_vm0, %v951_v17, 0.0 }
 0x331   :  { %v942_v26 = vadd.f32 %v941_v21, %v940_v19  ;;  %v957_v30 = vadd.f32 %v956_v25, %v955_v18 }
 0x333   :  { %v943_v31 = vrot.slane %v942_v26, 4  ;;  %v959_v34 = vadd.f32 %v958_v32, %v957_v30 }
 0x335   :  { %v944_v33 = vadd.f32 %v943_v31, %v942_v26  ;;  %v960_v38 = vrot.slane %v959_v34, 4 }
 0x337   :  { %v945_v36 = vrot.slane %v944_v33, 2  ;;  %v961_v41 = vadd.f32 %v960_v38, %v959_v34 }
 0x339   :  { %v946_v37 = vadd.f32 %v945_v36, %v944_v33  ;;  %v962_v42 = vrot.slane %v961_v41, 2 }
 0x33b   :  { %v947_v39 = vrot.slane %v946_v37, 1  ;;  %v963_v43 = vadd.f32 %v962_v42, %v961_v41 }
 0x33d   :  { %v948_v40 = vadd.f32 %v947_v39, %v946_v37  ;;  %v964_v44 = vrot.slane %v963_v43, 1 }
 0x33f   :  { %1652 = vmatmul.mubr.msk.f32.vlgmr.msra.gmra.mrb[8].mxu1 %vm42_vm0, %v948_v40  ;;  %v965_v23 = vadd.f32 %v964_v44, %v963_v43 }
 0x340   :  { %1879 = vmatpush3.bf16.msra.mxu1 %v1866_v49  ;;  %1670 = vmatprep.mubr.msk.f32.mxu1 %vm1941_vm2, %v1939_v5 }
 0x341   :  { %1880 = vmatprep.subr.bf16.mxu1 %v1940_v10 }
 0x344   :  { %1882 = vmatpush3.bf16.msra.mxu1 %v1869_v52 }
 0x345   :  { %1883 = vmatprep.subr.bf16.mxu1 %v1940_v10 }
 0x348   :  { %1885 = vmatpush3.bf16.msra.mxu1 %v1872_v55 }
 0x349   :  { %1886 = vmatprep.subr.bf16.mxu1 %v1940_v10 }
 0x34c   :  { %1888 = vmatpush3.bf16.msra.mxu1 %v1875_v58  ;;  %v1236_v58 = vld [vmem:[%s2467_s8] ss:$0 sm:$0xff]  ;;  %s1915_s8 = scalar_lea.vmem %s1163_s24, 512 }
 0x34d   :  { %p1916_p0 = scmp.ne.s32.totalorder %s1163_s24, %s1915_s8  ;;  %p1921_p2 = scmp.lt.s32.totalorder %s1915_s8, %s1915_s8 }
 0x34f   :  { %1671 = vmatmul.mubr.msk.f32.vlgmr.msra.gmra.mrb[10].mxu1 %vm42_vm0, %v965_v23  ;;  %p1922_p3 = por %p1921_p2, %p1920_p1 }
 0x351   :  { %p1923_p4 = pnand %p1922_p3, %p1916_p0 }
 0x412   :  { %v1035_v45 = vpop.f32.mrb[8].mxu1 }
 0x413   :  { %v1653_v28 = vpop.f32.mrb[9].mxu1  ;;  %v1112_v46 = vmul.f32 %v1035_v45, %v1035_v45  ;;  %v1120_v50 = vrot.slane %v1035_v45, %v2318_v35 }
 0x415   :  { %v1121_v53 = vsub.f32 %v2406_v62, %v1120_v50  ;;  %v1122_v54 = vsub.f32 %v2404_v27, %v1120_v50  ;;  %v1123_v55 = vsub.f32 %v1892_v12, %v1120_v50  ;;  %v1124_v56 = vsub.f32 %v1891_v4, %v1120_v50 }
 0x422   :  { %v1108_v47 = vpop.f32.mrb[10].mxu1 }
 0x423   :  { %v1113_v5 = vsub.f32 %v1108_v47, %v1112_v46  ;;  %v1672_v48 = vpop.f32.mrb[11].mxu1 }
 0x425   :  { %v1114_v49 = vadd.f32 1e-05, %v1113_v5 }
 0x427   :  { %1913 = vrsqrt.f32 %v1114_v49 }
 0x431   :  { %v1914_v10 = vpop.eup %1913 }
 0x432   :  { %v1116_v52 = vmul.f32 %v1914_v10, %v934_v51 }
 0x434   :  { %v1129_v57 = vrot.slane %v1116_v52, %v2318_v35 }
 0x436   :  { %v1131_v59 = vmul.f32 %v1129_v57, %v1121_v53  ;;  %v1132_v60 = vmul.f32 %v1129_v57, %v1122_v54  ;;  %v1133_v22 = vmul.f32 %v1129_v57, %v1123_v55  ;;  %v1134_v20 = vmul.f32 %v1129_v57, %v1124_v56 }
 0x438   :  { %v1141_v29 = vadd.f32 %v1236_v58, %v1131_v59  ;;  %v1142_v61 = vadd.f32 %v1236_v58, %v1132_v60  ;;  %v1143_v63 = vadd.f32 %v1236_v58, %v1133_v22  ;;  %v1144_v0 = vadd.f32 %v1236_v58, %v1134_v20 }
 0x43a   :  { %v1145_v27 = vadd.f32 %v1141_v29, %v2024_v9  ;;  %v1146_v62 = vadd.f32 %v1142_v61, %v2032_v11  ;;  %v1147_v35 = vadd.f32 %v1143_v63, %v2039_v13  ;;  %v1148_v1 = vadd.f32 %v1144_v0, %v2052_v16 }
 0x43c   :  { %v1149_v2 = vmax.f32 %v1145_v27, 0.0  ;;  %v1150_v3 = vmax.f32 %v1146_v62, 0.0  ;;  %v1151_v4 = vmax.f32 %v1147_v35, 0.0  ;;  %v1152_v6 = vmax.f32 %v1148_v1, 0.0 }
 0x43e   :  { %1153 = vst.msk [vmem:[#allocation4] sm:$0xff] %vm42_vm0, %v1149_v2  ;;  %1154 = vst.msk [vmem:[#allocation4 + $0x8] sm:$0xff] %vm42_vm0, %v1150_v3 }
 0x43f   :  { %1155 = vst.msk [vmem:[#allocation4 + $0x10] sm:$0xff] %vm42_vm0, %v1151_v4  ;;  %1156 = vst.msk [vmem:[#allocation4 + $0x18] sm:$0xff] %vm42_vm0, %v1152_v6 }
 0x440   :  { %1926 = shalt.err (!%p1923_p4)
}
 0x441   :  { %s1927_s27 = scalar_lea.hbm %s2468_s9, 512 }
 0x442   :  { %p1928_p5 = scmp.ne.s32.totalorder %s2468_s9, %s1927_s27  ;;  %p1931_p6 = scmp.lt.u32.totalorder %s1927_s27, %s2468_s9 }
 0x444   :  { %p1933_p7 = pnand %p1931_p6, %p1928_p5 }
 0x446   :  { %1936 = shalt.err (!%p1933_p7)
}
 0x447   :  { %s1943_s3 = smov 128   ;;  %s1944_s30 = smov 8  }
 0x448   :  { %1168 = dma.vmem_to_hbm [thread:$0]  %s1163_s24, 512, %s2468_s9, [#allocation5], %s1943_s3, %s1943_s3, %s1944_s30  }
 0x449   :  { %1937 = dma.done.wait [#allocation5], 512  }
 0x44a   :  { %1938 = vsyncadd [#allocation5], 4294966784 }
 0x44b   :  { %1172 = vsyncpa [#allocation5], 1 }

</bundles_post_ra>
